<compile_context>
chip_gen: v5e
topology: v5e:2x2
jax: 0.10.0
libtpu: 0.0.40
codegen_flags: <defaults>
</compile_context>

<pallas_src>
import functools
import math

import jax
import jax.numpy as jnp
from jax import lax
from jax.experimental import pallas as pl
from jax.experimental.pallas import tpu as pltpu


def _build_pe(max_len: int, d_model: int) -> jnp.ndarray:
    """Replicates the PyTorch buffer construction (deterministic)."""
    position = jnp.arange(0, max_len, dtype=jnp.float32)[:, None]          # [L, 1]
    div_term = jnp.exp(
        jnp.arange(0, d_model, 2, dtype=jnp.float32) * (-math.log(10000.0) / d_model)
    )                                                                       # [D/2]
    pe = jnp.zeros((max_len, d_model), dtype=jnp.float32)
    pe = pe.at[:, 0::2].set(jnp.sin(position * div_term))
    pe = pe.at[:, 1::2].set(jnp.cos(position * div_term))
    return pe                                                               # [L, D]


def _round_up(n: int, m: int) -> int:
    return ((n + m - 1) // m) * m


def _hash_u32(x):
    """lowbias32 integer hash (uint32 -> uint32), pure VPU integer ops."""
    x = x ^ (x >> 16)
    x = x * jnp.uint32(0x7FEB352D)
    x = x ^ (x >> 15)
    x = x * jnp.uint32(0x846CA68B)
    x = x ^ (x >> 16)
    return x


def _pe_dropout_kernel(seed_ref, x_ref, pe_ref, o_ref, *,
                       tile_s, batch, d_model, keep_threshold, inv_keep,
                       apply_dropout):
    # x_ref: (tile_s, B, D)   pe_ref: (tile_s, 1, D)   o_ref: (tile_s, B, D)
    y = x_ref[...] + pe_ref[...]            # broadcast over batch (size-1 dim)

    if apply_dropout:
        shp = (tile_s, batch, d_model)
        # Global element index -> deterministic, tile-order-independent mask.
        s_idx = lax.broadcasted_iota(jnp.int32, shp, 0).astype(jnp.uint32)
        b_idx = lax.broadcasted_iota(jnp.int32, shp, 1).astype(jnp.uint32)
        d_idx = lax.broadcasted_iota(jnp.int32, shp, 2).astype(jnp.uint32)
        s_glob = (pl.program_id(0) * tile_s).astype(jnp.uint32) + s_idx
        flat = (s_glob * jnp.uint32(batch) + b_idx) * jnp.uint32(d_model) + d_idx
        seed = seed_ref[0].astype(jnp.uint32)
        bits = _hash_u32(flat + seed * jnp.uint32(2654435761))
        # Integer-domain keep test: P(drop) = keep_threshold / 2^32 ~= p.
        keep = bits >= jnp.uint32(keep_threshold)
        y = jnp.where(keep, y * jnp.asarray(inv_keep, dtype=y.dtype),
                      jnp.zeros_like(y))

    o_ref[...] = y.astype(o_ref.dtype)


def positional_encoding(
    x: jnp.ndarray,
    pe: jnp.ndarray,
    *,
    p: float = 0.1,
    training: bool = True,
    seed: int = 0,
    use_pallas: bool | None = None,
    target_block_bytes: int = 2 << 20,     # ~2 MiB/block: 4 live copies < 16 MiB
) -> jnp.ndarray:
    """x: [seq_len, batch, d_model]; pe: [max_len, d_model] (f32 buffer)."""
    S, B, D = x.shape
    p = float(p)
    apply_dropout = bool(training) and p > 0.0

    pe_slice = pe[:S].astype(x.dtype)[:, None, :]          # [S, 1, D]

    # p >= 1.0 would divide by zero in 1/(1-p); PyTorch semantics -> all zeros.
    if apply_dropout and p >= 1.0:
        return jnp.zeros_like(x)

    # Tiny-tensor guard: pallas_call / per-step overhead dominates below ~1 MiB,
    # let XLA fuse add + dropout instead.
    if use_pallas is None:
        use_pallas = (x.size * x.dtype.itemsize) >= (1 << 20)
    if not use_pallas:
        y = x + pe_slice
        if apply_dropout:
            keep = jax.random.bernoulli(jax.random.PRNGKey(seed), 1.0 - p, x.shape)
            y = jnp.where(keep, y * (1.0 / (1.0 - p)), 0.0)
        return y.astype(x.dtype)

    # --- Pallas path -------------------------------------------------------
    # Seq-tile size from the *padded* VMEM layout ((8,128) tiles of the last
    # two dims), so small B/D can't blow the budget; double-buffered in + out
    # = 4 live blocks <= 4 * target_block_bytes (fits every generation's
    # default scoped VMEM: 16 MiB v5e, 32 MiB v6e/v7x).
    itemsize = x.dtype.itemsize
    padded_row_bytes = _round_up(B, 8) * _round_up(D, 128) * itemsize
    tile_s = int(max(1, min(S, target_block_bytes // padded_row_bytes)))
    grid = (pl.cdiv(S, tile_s),)

    keep_threshold = min(max(int(round(p * float(1 << 32))), 0), (1 << 32) - 1)
    inv_keep = 1.0 / (1.0 - p) if apply_dropout else 1.0

    kernel = functools.partial(
        _pe_dropout_kernel,
        tile_s=tile_s, batch=B, d_model=D,
        keep_threshold=keep_threshold, inv_keep=inv_keep,
        apply_dropout=apply_dropout,
    )

    seed_arr = jnp.asarray([seed], dtype=jnp.int32)

    grid_spec = pltpu.PrefetchScalarGridSpec(
        num_scalar_prefetch=1,                      # seed lands in SMEM
        grid=grid,
        in_specs=[
            pl.BlockSpec((tile_s, B, D), lambda i, seed: (i, 0, 0)),
            pl.BlockSpec((tile_s, 1, D), lambda i, seed: (i, 0, 0)),
        ],
        out_specs=pl.BlockSpec((tile_s, B, D), lambda i, seed: (i, 0, 0)),
    )

    # NOTE: input_output_aliases={1: 0} would drop the extra output allocation
    # (x and out have identical shape/dtype) but donates x; left off so callers
    # can keep using x.
    return pl.pallas_call(
        kernel,
        out_shape=jax.ShapeDtypeStruct((S, B, D), x.dtype),
        grid_spec=grid_spec,
        compiler_params=pltpu.CompilerParams(
            # Independent seq tiles (mask depends only on global index+seed):
            # lets v7x shard the grid over its 2 TensorCores.
            dimension_semantics=("parallel",),
        ),
    )(seed_arr, x, pe_slice)


if __name__ == "__main__":
    # Small shapes consistent with the module: seq=8, batch=2, d_model=32.
    S, B, D = 8, 2, 32
    max_len = 64  # small max_len for the demo (module default is 10000)

    key = jax.random.PRNGKey(0)
    x = jax.random.normal(key, (S, B, D), dtype=jnp.float32)
    pe = _build_pe(max_len, D)
    ref = x + pe[:S][:, None, :]

    # Eval mode (dropout = identity): exact semantics x + pe[:S].
    # use_pallas=True forces the kernel path even at demo-tiny shapes.
    out_eval = positional_encoding(x, pe, p=0.1, training=False, use_pallas=True)
    out_eval = jax.block_until_ready(out_eval)
    assert jnp.allclose(out_eval, ref, atol=1e-6, rtol=1e-6)

    # Training mode: every output element is either 0 (dropped) or
    # (x + pe) / (1 - p) (kept & rescaled).
    pdrop = 0.1
    out_train = positional_encoding(x, pe, p=pdrop, training=True, seed=0,
                                    use_pallas=True)
    out_train = jax.block_until_ready(out_train)
    assert out_train.shape == (S, B, D)
    scale = 1.0 / (1.0 - pdrop)
    ok = jnp.all((out_train == 0.0) | (jnp.abs(out_train - ref * scale) < 1e-5))
    assert bool(ok)

    print("KERNEL_OK")
</pallas_src>

<mosaic_0001>
module attributes {stable_mosaic.version = 11 : i64} {
  func.func @_pe_dropout_kernel(%arg0: i32, %arg1: memref<1xi32, #tpu.memory_space<smem>>, %arg2: memref<8x2x32xf32, #tpu.memory_space<vmem>>, %arg3: memref<8x1x32xf32, #tpu.memory_space<vmem>>, %arg4: memref<8x2x32xf32, #tpu.memory_space<vmem>>) attributes {dimension_semantics = [#tpu.dimension_semantics<parallel>], iteration_bounds = array<i64: 1>, scalar_prefetch = 1 : i64, scratch_operands = 0 : i64, tpu.core_type = #tpu.core_type<tc>, window_params = [{transform_indices = @transform_0, window_bounds = array<i64: 8, 2, 32>}, {transform_indices = @transform_1, window_bounds = array<i64: 8, 1, 32>}, {transform_indices = @transform_2, window_bounds = array<i64: 8, 2, 32>}]} {
    %c0 = arith.constant 0 : index
    %c0_0 = arith.constant 0 : index
    %c0_1 = arith.constant 0 : index
    %0 = vector.load %arg2[%c0, %c0_0, %c0_1] : memref<8x2x32xf32, #tpu.memory_space<vmem>>, vector<8x2x32xf32>
    %c0_2 = arith.constant 0 : index
    %c0_3 = arith.constant 0 : index
    %c0_4 = arith.constant 0 : index
    %1 = vector.load %arg3[%c0_2, %c0_3, %c0_4] : memref<8x1x32xf32, #tpu.memory_space<vmem>>, vector<8x1x32xf32>
    %2 = vector.broadcast %1 : vector<8x1x32xf32> to vector<8x2x32xf32>
    %3 = arith.addf %0, %2 : vector<8x2x32xf32>
    %c0_5 = arith.constant 0 : index
    %c0_6 = arith.constant 0 : index
    %c0_7 = arith.constant 0 : index
    %4 = vector.load %arg4[%c0_5, %c0_6, %c0_7] : memref<8x2x32xf32, #tpu.memory_space<vmem>>, vector<8x2x32xf32>
    tpu.vector_store %arg4[%c0_5, %c0_6, %c0_7], %3 {strides = array<i32>} : memref<8x2x32xf32, #tpu.memory_space<vmem>>, vector<8x2x32xf32>,
    return
  }
  func.func @transform_0(%arg0: i32, %arg1: memref<1xi32, #tpu.memory_space<smem>>) -> (i32, i32, i32) {
    %c0_i32 = arith.constant 0 : i32
    %c0_i32_0 = arith.constant 0 : i32
    %c0_i32_1 = arith.constant 0 : i32
    return %arg0, %c0_i32, %c0_i32_0 : i32, i32, i32
  }
  func.func @transform_1(%arg0: i32, %arg1: memref<1xi32, #tpu.memory_space<smem>>) -> (i32, i32, i32) {
    %c0_i32 = arith.constant 0 : i32
    %c0_i32_0 = arith.constant 0 : i32
    %c0_i32_1 = arith.constant 0 : i32
    return %arg0, %c0_i32, %c0_i32_0 : i32, i32, i32
  }
  func.func @transform_2(%arg0: i32, %arg1: memref<1xi32, #tpu.memory_space<smem>>) -> (i32, i32, i32) {
    %c0_i32 = arith.constant 0 : i32
    %c0_i32_0 = arith.constant 0 : i32
    %c0_i32_1 = arith.constant 0 : i32
    return %arg0, %c0_i32, %c0_i32_0 : i32, i32, i32
  }
}

</mosaic_0001>

<bundles_post_ra>
// kernel: tpu_custom_call.1
= control target key start
LH: loop header
LB: loop body
LE: loop exit
PB: predicated region body
PF: predicated region fallthrough
CT: control target
= control target key end

     0   :  { %9 = vsyncpa [#allocation5], 0  ;;  %s273_s0 = inlined_call_operand.<no memory space> [shape: s32[1], index: 0, kind: input, shape index: {}]   ;;  %s274_s1 = inlined_call_operand.hbm [shape: f32[8,2,32], index: 1, kind: input, shape index: {}]   ;;  %s275_s2 = inlined_call_operand.hbm [shape: f32[8,1,32], index: 2, kind: input, shape index: {}]   ;;  %s276_s3 = inlined_call_operand.hbm [shape: f32[8,2,32], index: 3, kind: output, shape index: {}]  }
   0x1   :  { %10 = vsyncpa [#allocation8], 0 }
   0x2   :  { %11 = vsyncpa [#allocation6], 0  ;;  %s16_s14 = sshll.u32 %s274_s1, 4  ;;  %s216_s15 = smov [#allocation4]   ;;  %s17_s14 = int_to_ptr.hbm [resolvable:$true] %s16_s14 }
   0x3   :  { %s18_s16 = sshll.u32 %s216_s15, 4  ;;  %s29_s18 = sshll.u32 %s275_s2, 4  ;;  %s19_s16 = int_to_ptr.vmem [resolvable:$true] %s18_s16  ;;  %s30_s18 = int_to_ptr.hbm [resolvable:$true] %s29_s18 }
   0x4   :  { %s217_s19 = smov 32   ;;  %s218_s20 = smov 2  }
   0x5   :  { %24 = dma.hbm_to_vmem [thread:$0]  %s17_s14, 256, %s19_s16, [#allocation5], %s217_s19, %s217_s19, %s218_s20  }
   0x6   :  { %s219_s21 = smov [#allocation7]   ;;  %s220_s23 = smov 16  }
   0x7   :  { %s31_s22 = sshll.u32 %s219_s21, 4  ;;  %s221_s1 = smov 1   ;;  %s32_s22 = int_to_ptr.vmem [resolvable:$true] %s31_s22 }
   0x8   :  { %37 = dma.hbm_to_vmem [thread:$0]  %s30_s18, 128, %s32_s22, [#allocation8], %s220_s23, %s220_s23, %s221_s1  }
   0x9   :  { %210 = dma.done.wait [#allocation5], 256  }
   0xa   :  { %211 = vsyncadd [#allocation5], 4294967040 }
   0xb   :  { %212 = dma.done.wait [#allocation8], 128  }
   0xc   :  { %213 = vsyncadd [#allocation8], 4294967168  ;;  %vm94_vm0 = vcmask 254976   ;;  %s222_s24 = smov [#allocation9]   ;;  %s109_s27 = sshll.u32 %s276_s3, 4  ;;  %s110_s27 = int_to_ptr.hbm [resolvable:$true] %s109_s27 }
   0xd   :  { %s252_s2 = sshll.u32 %s222_s24, 4  ;;  %v46_v0 = vld [vmem:[#allocation4] sm:$0x3]  ;;  %v130_v1 = vld [vmem:[#allocation7] ss:$0 sm:$0xff]  ;;  %s108_s2 = int_to_ptr.vmem [resolvable:$true] %s252_s2 }
   0xe   :  { %v47_v2 = vld [vmem:[#allocation4 + $0x2] sm:$0x3]  ;;  %v131_v3 = vld [vmem:[#allocation7 + $0x1] ss:$0 sm:$0xff]  ;;  %v86_v4 = vadd.f32 %v130_v1, %v46_v0  ;;  %v48_v5 = vld [vmem:[#allocation4 + $0x4] sm:$0x3] }
   0xf   :  { %v132_v6 = vld [vmem:[#allocation7 + $0x2] ss:$0 sm:$0xff]  ;;  %v87_v7 = vadd.f32 %v131_v3, %v47_v2  ;;  %v49_v8 = vld [vmem:[#allocation4 + $0x6] sm:$0x3]  ;;  %v133_v9 = vld [vmem:[#allocation7 + $0x3] ss:$0 sm:$0xff] }
  0x10   :  { %95 = vst.msk [vmem:[#allocation9] sm:$0x3] %vm94_vm0, %v86_v4  ;;  %v88_v10 = vadd.f32 %v132_v6, %v48_v5  ;;  %v50_v11 = vld [vmem:[#allocation4 + $0x8] sm:$0x3]  ;;  %v89_v12 = vadd.f32 %v133_v9, %v49_v8  ;;  %v134_v13 = vld [vmem:[#allocation7 + $0x4] ss:$0 sm:$0xff] }
  0x11   :  { %96 = vst.msk [vmem:[#allocation9 + $0x2] sm:$0x3] %vm94_vm0, %v87_v7  ;;  %v51_v14 = vld [vmem:[#allocation4 + $0xa] sm:$0x3]  ;;  %v135_v15 = vld [vmem:[#allocation7 + $0x5] ss:$0 sm:$0xff]  ;;  %v90_v16 = vadd.f32 %v134_v13, %v50_v11 }
  0x12   :  { %97 = vst.msk [vmem:[#allocation9 + $0x4] sm:$0x3] %vm94_vm0, %v88_v10  ;;  %v52_v17 = vld [vmem:[#allocation4 + $0xc] sm:$0x3]  ;;  %v91_v18 = vadd.f32 %v135_v15, %v51_v14  ;;  %v136_v19 = vld [vmem:[#allocation7 + $0x6] ss:$0 sm:$0xff] }
  0x13   :  { %98 = vst.msk [vmem:[#allocation9 + $0x6] sm:$0x3] %vm94_vm0, %v89_v12  ;;  %v53_v20 = vld [vmem:[#allocation4 + $0xe] sm:$0x3]  ;;  %v137_v21 = vld [vmem:[#allocation7 + $0x7] ss:$0 sm:$0xff]  ;;  %v92_v22 = vadd.f32 %v136_v19, %v52_v17 }
  0x14   :  { %99 = vst.msk [vmem:[#allocation9 + $0x8] sm:$0x3] %vm94_vm0, %v90_v16  ;;  %v93_v23 = vadd.f32 %v137_v21, %v53_v20 }
  0x15   :  { %100 = vst.msk [vmem:[#allocation9 + $0xa] sm:$0x3] %vm94_vm0, %v91_v18 }
  0x16   :  { %101 = vst.msk [vmem:[#allocation9 + $0xc] sm:$0x3] %vm94_vm0, %v92_v22 }
  0x17   :  { %102 = vst.msk [vmem:[#allocation9 + $0xe] sm:$0x3] %vm94_vm0, %v93_v23 }
  0x18   :  { %115 = dma.vmem_to_hbm [thread:$0]  %s108_s2, 256, %s110_s27, [#allocation6], %s217_s19, %s217_s19, %s218_s20  }
  0x19   :  { %214 = dma.done.wait [#allocation6], 256  }
  0x1a   :  { %215 = vsyncadd [#allocation6], 4294967040 }
  0x1b   :  { %120 = vsyncpa [#allocation5], 1 }
  0x1c   :  { %121 = vsyncpa [#allocation8], 1 }
  0x1d   :  { %122 = vsyncpa [#allocation6], 1 }

</bundles_post_ra>
